<compile_context>
chip_gen: v6e
topology: v6e:2x2x1
jax: 0.10.0
libtpu: 0.0.40
codegen_flags: <defaults>
</compile_context>

<pallas_src>
import functools

import jax
import jax.numpy as jnp
from jax.experimental import pallas as pl
from jax.experimental.pallas import tpu as pltpu


def _cdiv(a, b):
    return -(-a // b)


def _maxpool_kernel(x_ref, o_ref, *, kernel_size, stride, out_w):
    # x_ref block: (stride, stride, th_in, ws, lb)   phase-decomposed, zero-padded,
    #                                                batch*channel chunk on lanes.
    # o_ref block: (th, out_w, lb)
    th = o_ref.shape[0]
    ws = x_ref.shape[3]
    # Fast path: k <= s and the phase block is exactly the output tile -> no slicing.
    full_block = (kernel_size <= stride) and (ws == out_w) and (x_ref.shape[2] == th)

    acc = None
    for ki in range(kernel_size):
        qh, rh = divmod(ki, stride)
        for kj in range(kernel_size):
            qw, rw = divmod(kj, stride)
            if full_block:
                win = x_ref[rh, rw, :, :, :]
            else:
                # Contiguous static slice; the lane axis is never sliced.
                win = x_ref[rh, rw, qh:qh + th, qw:qw + out_w, :]
            acc = win if acc is None else jnp.maximum(acc, win)
    o_ref[...] = acc.astype(o_ref.dtype)


def _pick_tile(out_h, th_max):
    """Largest out_h tile <= th_max; prefer an exact divisor to avoid ragged blocks."""
    th_max = max(1, min(out_h, th_max))
    if out_h <= th_max:
        return out_h
    best_div = max((d for d in range(1, th_max + 1) if out_h % d == 0), default=1)
    if best_div * 2 >= th_max:
        return best_div
    return th_max          # ragged last tile: OOB input rows are zero pad, OOB writes masked


def max_pool2d(x, kernel_size, stride=None, padding=0):
    """MaxPool2d forward matching the PyTorch MaxPool2dFunction semantics (NCHW)."""
    stride = kernel_size if stride is None else stride
    b, c, h, w = x.shape
    out_h = (h + 2 * padding - kernel_size) // stride + 1
    out_w = out_h  # reference hard-codes output_width = output_height
    bc = b * c
    itemsize = jnp.dtype(x.dtype).itemsize

    # ---- lane (batch*channel) tiling --------------------------------------
    # Lane-dense 128-wide blocks whenever padding overhead is <= 2x; for tiny bc
    # keep lb = bc (masked stores, but far less HBM traffic than padding 8 -> 128).
    if bc >= 64:
        lb = 128
        bcp = _cdiv(bc, 128) * 128
    else:
        lb = bc
        bcp = bc
    n_lane_tiles = bcp // lb

    # ---- phase-decomposed spatial extents ----------------------------------
    hp = h + 2 * padding
    wp = w + 2 * padding
    q_max = (kernel_size - 1) // stride          # per-phase halo rows/cols when k > s
    hs = max(_cdiv(hp, stride), out_h + q_max)
    ws = max(_cdiv(wp, stride), out_w + q_max)

    # ---- generation-aware VMEM budget & out_h tiling ------------------------
    try:
        vmem_cap = int(pltpu.get_tpu_info().vmem_capacity_bytes)
    except Exception:                             # not on TPU / API unavailable
        vmem_cap = 64 << 20                       # conservative: v7x per-TC
    budget = max(32 << 20, min(vmem_cap * 3 // 4, vmem_cap - (16 << 20)))
    headroom = 4 << 20                            # Mosaic internal scratch, slack

    in_row_bytes = stride * stride * ws * lb * itemsize   # bytes per out_h row, input block
    out_row_bytes = out_w * lb * itemsize

    tileable = kernel_size <= stride              # no halo -> plain Blocked out_h axis
    if tileable:
        th_max = max(1, (budget - headroom) // (2 * (in_row_bytes + out_row_bytes)))
        if n_lane_tiles == 1 and out_h > 1:
            # Keep >= 2 grid steps: DMA/compute overlap + v7x dual-TC sharding.
            th_max = min(th_max, _cdiv(out_h, 2))
        th = _pick_tile(out_h, th_max)
        n_h_tiles = _cdiv(out_h, th)
        hs = max(hs, n_h_tiles * th)              # every input block stays in bounds
        th_in = th
    else:
        # TODO(synk): k > s needs an overlapping (halo) hs tile; fall back to a
        # whole-plane block per step (correct; may exceed VMEM only for huge planes).
        th = out_h
        n_h_tiles = 1
        th_in = hs

    hp2, wp2 = hs * stride, ws * stride

    # ---- relayout: zero-pad + de-interleave stride phases + bc -> lanes -----
    # Single fused XLA copy pass (pad/reshape/transpose); F.unfold zero-pad semantics.
    xp = jnp.pad(
        x.reshape(bc, h, w),
        ((0, bcp - bc), (padding, hp2 - h - padding), (padding, wp2 - w - padding)),
    )
    xr = xp.reshape(bcp, hs, stride, ws, stride).transpose(2, 4, 1, 3, 0)

    kernel = functools.partial(
        _maxpool_kernel, kernel_size=kernel_size, stride=stride, out_w=out_w,
    )

    in_block_bytes = stride * stride * th_in * ws * lb * itemsize
    out_block_bytes = th * out_w * lb * itemsize
    # Declared limit always covers the real double-buffered footprint (we shrink the
    # tile to fit the budget instead of clamping the limit), never exceeds capacity.
    vmem_limit = int(min(max(2 * (in_block_bytes + out_block_bytes) + headroom,
                             32 << 20), vmem_cap))

    # TODO(synk): for small out_w, emitting a flattened (out_h*out_w, lb) output slab
    # would recover partial-sublane store bandwidth; skipped (layout plumbing only).

    out = pl.pallas_call(
        kernel,
        out_shape=jax.ShapeDtypeStruct((out_h, out_w, bcp), x.dtype),
        grid_spec=pltpu.PrefetchScalarGridSpec(
            num_scalar_prefetch=0,
            grid=(n_lane_tiles, n_h_tiles),
            in_specs=[
                pl.BlockSpec(
                    (stride, stride, th_in, ws, lb),
                    lambda i, j: (0, 0, j, 0, i),
                )
            ],
            out_specs=pl.BlockSpec((th, out_w, lb), lambda i, j: (j, 0, i)),
        ),
        compiler_params=pltpu.CompilerParams(
            dimension_semantics=("parallel", "parallel"),
            vmem_limit_bytes=vmem_limit,
        ),
    )(xr)

    # Back to NCHW (small, output-sized transpose).
    return out.transpose(2, 0, 1)[:bc].reshape(b, c, out_h, out_w)


def _ref_maxpool(x, kernel_size, stride, padding):
    """Pure-JAX reference with the same (zero-pad) semantics as the PyTorch module."""
    b, c, h, w = x.shape
    out_h = (h + 2 * padding - kernel_size) // stride + 1
    out_w = out_h
    xp = jnp.pad(x, ((0, 0), (0, 0), (padding, padding), (padding, padding)))
    r = jax.lax.reduce_window(
        xp, -jnp.inf, jax.lax.max,
        window_dimensions=(1, 1, kernel_size, kernel_size),
        window_strides=(1, 1, stride, stride),
        padding="VALID",
    )
    return r[:, :, :out_h, :out_w]


if __name__ == "__main__":
    key = jax.random.PRNGKey(0)
    x = jax.random.normal(key, (2, 4, 16, 16), dtype=jnp.float32)

    # Config 1: kernel_size=2, stride=None (-> 2), padding=0  (MaxPool2d(2, None))
    out1 = max_pool2d(x, kernel_size=2, stride=None, padding=0)
    out1 = jax.block_until_ready(out1)
    ref1 = _ref_maxpool(x, 2, 2, 0)
    assert out1.shape == (2, 4, 8, 8), out1.shape
    assert jnp.allclose(out1, ref1, atol=1e-6), "mismatch for k=2,s=2,p=0"

    # Config 2: kernel_size=3, stride=2, padding=1  (exercises padding + k > s path)
    out2 = max_pool2d(x, kernel_size=3, stride=2, padding=1)
    out2 = jax.block_until_ready(out2)
    ref2 = _ref_maxpool(x, 3, 2, 1)
    assert out2.shape == (2, 4, 8, 8), out2.shape
    assert jnp.allclose(out2, ref2, atol=1e-6), "mismatch for k=3,s=2,p=1"

    print("KERNEL_OK")
</pallas_src>

<mosaic_0001>
module attributes {stable_mosaic.version = 11 : i64} {
  func.func @_maxpool_kernel(%arg0: i32, %arg1: i32, %arg2: memref<2x2x4x8x8xf32, #tpu.memory_space<vmem>>, %arg3: memref<4x8x8xf32, #tpu.memory_space<vmem>>) attributes {dimension_semantics = [#tpu.dimension_semantics<parallel>, #tpu.dimension_semantics<parallel>], iteration_bounds = array<i64: 1, 2>, scalar_prefetch = 0 : i64, scratch_operands = 0 : i64, tpu.core_type = #tpu.core_type<tc>, window_params = [{transform_indices = @transform_0, window_bounds = array<i64: 2, 2, 4, 8, 8>}, {transform_indices = @transform_1, window_bounds = array<i64: 4, 8, 8>}]} {
    %c0 = arith.constant 0 : index
    %c0_0 = arith.constant 0 : index
    %c0_1 = arith.constant 0 : index
    %c0_2 = arith.constant 0 : index
    %c0_3 = arith.constant 0 : index
    %0 = vector.load %arg2[%c0, %c0_0, %c0_1, %c0_2, %c0_3] : memref<2x2x4x8x8xf32, #tpu.memory_space<vmem>>, vector<1x1x4x8x8xf32>
    %1 = vector.shape_cast %0 : vector<1x1x4x8x8xf32> to vector<4x8x8xf32>
    %c0_4 = arith.constant 0 : index
    %c1 = arith.constant 1 : index
    %c0_5 = arith.constant 0 : index
    %c0_6 = arith.constant 0 : index
    %c0_7 = arith.constant 0 : index
    %2 = vector.load %arg2[%c0_4, %c1, %c0_5, %c0_6, %c0_7] : memref<2x2x4x8x8xf32, #tpu.memory_space<vmem>>, vector<1x1x4x8x8xf32>
    %3 = vector.shape_cast %2 : vector<1x1x4x8x8xf32> to vector<4x8x8xf32>
    %4 = arith.maximumf %1, %3 : vector<4x8x8xf32>
    %c1_8 = arith.constant 1 : index
    %c0_9 = arith.constant 0 : index
    %c0_10 = arith.constant 0 : index
    %c0_11 = arith.constant 0 : index
    %c0_12 = arith.constant 0 : index
    %5 = vector.load %arg2[%c1_8, %c0_9, %c0_10, %c0_11, %c0_12] : memref<2x2x4x8x8xf32, #tpu.memory_space<vmem>>, vector<1x1x4x8x8xf32>
    %6 = vector.shape_cast %5 : vector<1x1x4x8x8xf32> to vector<4x8x8xf32>
    %7 = arith.maximumf %4, %6 : vector<4x8x8xf32>
    %c1_13 = arith.constant 1 : index
    %c1_14 = arith.constant 1 : index
    %c0_15 = arith.constant 0 : index
    %c0_16 = arith.constant 0 : index
    %c0_17 = arith.constant 0 : index
    %8 = vector.load %arg2[%c1_13, %c1_14, %c0_15, %c0_16, %c0_17] : memref<2x2x4x8x8xf32, #tpu.memory_space<vmem>>, vector<1x1x4x8x8xf32>
    %9 = vector.shape_cast %8 : vector<1x1x4x8x8xf32> to vector<4x8x8xf32>
    %10 = arith.maximumf %7, %9 : vector<4x8x8xf32>
    %c0_18 = arith.constant 0 : index
    %c0_19 = arith.constant 0 : index
    %c0_20 = arith.constant 0 : index
    %11 = vector.load %arg3[%c0_18, %c0_19, %c0_20] : memref<4x8x8xf32, #tpu.memory_space<vmem>>, vector<4x8x8xf32>
    tpu.vector_store %arg3[%c0_18, %c0_19, %c0_20], %10 {strides = array<i32>} : memref<4x8x8xf32, #tpu.memory_space<vmem>>, vector<4x8x8xf32>,
    return
  }
  func.func @transform_0(%arg0: i32, %arg1: i32) -> (i32, i32, i32, i32, i32) {
    %c0_i32 = arith.constant 0 : i32
    %c0_i32_0 = arith.constant 0 : i32
    %c0_i32_1 = arith.constant 0 : i32
    %c0_i32_2 = arith.constant 0 : i32
    return %c0_i32, %c0_i32_0, %arg1, %c0_i32_1, %arg0 : i32, i32, i32, i32, i32
  }
  func.func @transform_1(%arg0: i32, %arg1: i32) -> (i32, i32, i32) {
    %c0_i32 = arith.constant 0 : i32
    %c0_i32_0 = arith.constant 0 : i32
    return %arg1, %c0_i32, %arg0 : i32, i32, i32
  }
}

</mosaic_0001>

<bundles_post_ra>
// kernel: tpu_custom_call.1
= control target key start
LH: loop header
LB: loop body
LE: loop exit
PB: predicated region body
PF: predicated region fallthrough
CT: control target
= control target key end

     0   :  { %6 = vsyncpa [#allocation3], 0  ;;  %s693_s0 = inlined_call_operand.hbm [shape: f32[2,2,8,8,8], index: 0, kind: input, shape index: {}]   ;;  %s694_s1 = inlined_call_operand.hbm [shape: f32[8,8,8], index: 1, kind: output, shape index: {}]  }
   0x1   :  { %8 = vsyncpa [#allocation3 + $0x1], 0 }
   0x2   :  { %9 = vsyncpa [#allocation4], 0 }
   0x3   :  { %11 = vsyncpa [#allocation4 + $0x1], 0  ;;  %s519_s6 = smov 0   ;;  %s521_s7 = smov 0  }
   0x4   :  { %s523_s8 = smov 0   ;;  %s525_s9 = smov 0  }
   0x5   :  { %s527_s10 = smov 0   ;;  %s529_s11 = smov 0  }
   0x6 LB: > { %s315_s12 = sadd.s32 4294967295, %s498_s11   ;;  %s316_s13 = sadd.s32 4294967294, %s498_s11   ;;  %s498_s11 = sphi %s529_s11, %s17_s11   ;;  %s494_s10 = sphi %s527_s10, %s703_s10   ;;  %s490_s9 = sphi %s525_s9, %s702_s9   ;;  %s486_s8 = sphi %s523_s8, %s701_s8   ;;  %s482_s7 = sphi %s521_s7, %s700_s7   ;;  %s478_s6 = sphi %s519_s6, %s699_s6  }
   0x7   : > { %s26_s14 = sadd.s32 1, %s494_s10  ;;  %s38_s15 = sadd.s32 1, %s486_s8 }
   0x8   : > { %p27_p0 = scmp.ge.s32.totalorder %s26_s14, 2  ;;  %p45_p1 = scmp.ne.s32.totalorder %s486_s8, %s482_s7 }
   0x9   : > { %p46_p2 = scmp.eq.s32.totalorder %s498_s11, 0  ;;  %p51_p3 = scmp.ne.s32.totalorder %s482_s7, %s478_s6 }
   0xa   : > { %s705_s14 = smov (%p27_p0, %s26_s14), 0  ;;  %p52_p5 = scmp.eq.s32.totalorder %s315_s12, 0 }
   0xb   : > { %p560_p4 = por %p46_p2, %p45_p1  ;;  %s33_s17 = ssub.s32 %s494_s10, %s705_s14 }
   0xc   : > { %p77_p6 = scmp.eq.s32.totalorder %s315_s12, 1  ;;  %p36_p7 = scmp.eq.s32.totalorder %s33_s17, 0 }
   0xd   : > { %p566_p8 = por %p52_p5, %p51_p3  ;;  %p83_p10 = scmp.eq.s32.totalorder %s316_s13, 1 }
   0xe   : > { %p570_p9 = por %p77_p6, %p45_p1  ;;  %p318_p12 = scmp.ge.s32.totalorder %s498_s11, 2 }
   0xf   : > { %s575_s20 = scalar_select %p36_p7, %s486_s8, %s38_s15  }
  0x10   : > { %p577_p11 = por %p83_p10, %p51_p3  ;;  %99 = sbr.rel (%p318_p12) target bundleno = 34 (0x22), region = 16 }
  0x15   : > { %s103_s22 = sand.u32 1, %s486_s8   ;;  %s344_s23 = sshll.u32 %s494_s10, 9 }
  0x16   : > { %s319_s24 = sshll.u32 %s103_s22, 7  ;;  %s114_s27 = scalar_lea.hbm %s693_s0, %s344_s23 }
  0x17   : > { %s346_s28 = scalar_select %p560_p4, [#allocation0], [#allocation8] }
  0x18   : > { %s107_s29 = scalar_lea.vmem [#allocation2], %s319_s24  ;;  %s500_s3 = smov 1024  }
  0x19   : > { %s127_s30 = sshll.u32 %s107_s29, 4  ;;  %s119_s2 = sld [smem:[%s346_s28]]   ;;  %s128_s30 = int_to_ptr.vmem [resolvable:$true] %s127_s30 }
  0x1a   : > { %347 = sst [smem:[#allocation7]] (%p560_p4), %s500_s3  ;;  %s501_s4 = smov 512  }
  0x1b   : > { %348 = sst [smem:[#allocation7 + $0x1]] (%p560_p4), %s501_s4  ;;  %s502_s5 = smov 4  }
  0x1c   : > { %349 = sst [smem:[#allocation7 + $0x2]] (%p560_p4), %s502_s5  ;;  %s503_s12 = smov 128  }
  0x1d   : > { %350 = sst [smem:[#allocation7 + $0x3]] (%p560_p4), %s503_s12  ;;  %s504_s15 = smov 8  }
  0x1e   : > { %351 = sst [smem:[#allocation7 + $0x4]] (%p560_p4), %s503_s12  ;;  %s104_s23 = scalar_lea.sflag [#allocation3], %s103_s22 }
  0x1f   : > { %s322_s13 = sshll.u32 %s119_s2, 26  ;;  %352 = sst [smem:[#allocation7 + $0x5]] (%p560_p4), %s504_s15 }
  0x20   : > { %s323_s17 = sadd.s32 134217728, %s322_s13  ;;  %s505_s24 = smov 131072  }
  0x21   : > { %353 = dma.general (%p560_p4), %s114_s27, 2048, %s128_s30, %s104_s23, %s505_s24, [#allocation7], %s323_s17, 0  }
  0x22 PF: > { %p324_p13 = scmp.ge.s32.totalorder %s498_s11, 1  ;;  %p148_p0 = scmp.lt.s32.totalorder %s498_s11, 3 }
  0x24   : > { %p149_p1 = pnand %p324_p13, %p148_p0 }
  0x25   : > { %s608_s25 = sand.u32 (!%p149_p1), 1, %s482_s7  }
  0x26   : > { %152 = sbr.rel (%p149_p1) target bundleno = 70 (0x46), region = 24  ;;  %s325_s26 = sshll.u32 (!%p149_p1), %s608_s25, 7 }
  0x27   : > { %s155_s28 = scalar_lea.sflag (!%p149_p1), [#allocation3], %s608_s25  ;;  %s612_s29 = scalar_lea.vmem (!%p149_p1), [#allocation2], %s325_s26 }
  0x2b   : > { %469 = dma.done.wait (%p566_p8), %s155_s28, 2048  }
  0x2c   : > { %471 = vsyncadd (%p566_p8), %s155_s28, 4294965248  ;;  %s326_s16 = sshll.u32 %s608_s25, 5  ;;  %v179_v0 = vld [vmem:[%s612_s29] sm:$0xff]  ;;  %v180_v4 = vld [vmem:[%s612_s29 + $0x8] sm:$0xff]  ;;  %vm210_vm0 = vcmask 64512   ;;  %s345_s27 = sshll.u32 %s490_s9, 9 }
  0x2d   : > { %v327_v1 = vld [vmem:[%s612_s29 + $0x20] sm:$0xff]  ;;  %v328_v5 = vld [vmem:[%s612_s29 + $0x28] sm:$0xff]  ;;  %v181_v9 = vld [vmem:[%s612_s29 + $0x10] sm:$0xff]  ;;  %s176_s18 = scalar_lea.vmem [#allocation5], %s326_s16  ;;  %s643_s3 = scalar_lea.hbm %s694_s1, %s345_s27 }
  0x2e   : > { %v331_v2 = vld [vmem:[%s612_s29 + $0x40] sm:$0xff]  ;;  %v188_v3 = vmax.f32 %v179_v0, %v327_v1  ;;  %v189_v7 = vmax.f32 %v180_v4, %v328_v5  ;;  %v332_v8 = vld [vmem:[%s612_s29 + $0x48] sm:$0xff]  ;;  %v329_v12 = vld [vmem:[%s612_s29 + $0x30] sm:$0xff]  ;;  %s230_s22 = sshll.u32 %s176_s18, 4  ;;  %s216_s9 = scalar_lea.sflag [#allocation4], %s608_s25  ;;  %s637_s22 = int_to_ptr.vmem [resolvable:$true] %s230_s22 }
  0x2f   : > { %v335_v6 = vld [vmem:[%s612_s29 + $0x60] sm:$0xff]  ;;  %v336_v11 = vld [vmem:[%s612_s29 + $0x68] sm:$0xff]  ;;  %v333_v13 = vld [vmem:[%s612_s29 + $0x50] sm:$0xff]  ;;  %v190_v15 = vmax.f32 %v181_v9, %v329_v12  ;;  %s418_s4 = scalar_lea.vmem %s637_s22, 512  ;;  %s506_s5 = smov [#allocation5]  }
  0x30   : > { %v197_v10 = vmax.f32 %v188_v3, %v331_v2  ;;  %v198_v14 = vmax.f32 %v189_v7, %v332_v8  ;;  %v182_v16 = vld [vmem:[%s612_s29 + $0x18] sm:$0xff]  ;;  %v337_v20 = vld [vmem:[%s612_s29 + $0x70] sm:$0xff]  ;;  %p419_p2 = scmp.ne.s32.totalorder %s637_s22, %s418_s4  ;;  %s422_s12 = sshll.u32 %s506_s5, 4  ;;  %s423_s12 = int_to_ptr.vmem [resolvable:$false] %s422_s12 }
  0x31   : > { %v330_v17 = vld [vmem:[%s612_s29 + $0x38] sm:$0xff]  ;;  %v199_v23 = vmax.f32 %v190_v15, %v333_v13  ;;  %s424_s13 = scalar_lea.vmem %s423_s12, 1024  ;;  %p425_p5 = scmp.lt.s32.totalorder %s637_s22, %s423_s12 }
  0x32   : > { %v334_v18 = vld [vmem:[%s612_s29 + $0x58] sm:$0xff]  ;;  %v206_v19 = vmax.f32 %v197_v10, %v335_v6  ;;  %v191_v21 = vmax.f32 %v182_v16, %v330_v17  ;;  %v207_v22 = vmax.f32 %v198_v14, %v336_v11  ;;  %p420_p3 = pnand %p419_p2, %p570_p9  ;;  %p426_p6 = scmp.lt.s32.totalorder %s424_s13, %s418_s4 }
  0x33   : > { %v338_v24 = vld [vmem:[%s612_s29 + $0x78] sm:$0xff]  ;;  %v208_v26 = vmax.f32 %v199_v23, %v337_v20 }
  0x34   : > { %211 = vst.msk [vmem:[%s176_s18] sm:$0xff] %vm210_vm0, %v206_v19  ;;  %v200_v25 = vmax.f32 %v191_v21, %v334_v18  ;;  %212 = vst.msk [vmem:[%s176_s18 + $0x8] sm:$0xff] %vm210_vm0, %v207_v22  ;;  %p421_p4 = pneg %p420_p3  ;;  %p427_p7 = por %p426_p6, %p425_p5 }
  0x35   : > { %213 = vst.msk [vmem:[%s176_s18 + $0x10] sm:$0xff] %vm210_vm0, %v208_v26 }
  0x36   : > { %v209_v27 = vmax.f32 %v200_v25, %v338_v24  ;;  %p428_p8 = pnand %p427_p7, %p421_p4 }
  0x38   : > { %214 = vst.msk [vmem:[%s176_s18 + $0x18] sm:$0xff] %vm210_vm0, %v209_v27 }
  0x39   : > { %431 = shalt.err (!%p428_p8)
}
  0x3a   : > { %s432_s15 = scalar_lea.hbm %s643_s3, 512  ;;  %s436_s24 = scalar_lea.hbm %s694_s1, 1024 }
  0x3b   : > { %p433_p10 = scmp.ne.s32.totalorder %s643_s3, %s432_s15  ;;  %p437_p1 = scmp.lt.s32.totalorder %s643_s3, %s694_s1 }
  0x3c   : > { %p438_p2 = scmp.lt.s32.totalorder %s436_s24, %s432_s15 }
  0x3d   : > { %p434_p13 = pnand %p433_p10, %p570_p9 }
  0x3e   : > { %p439_p3 = por %p438_p2, %p437_p1 }
  0x3f   : > { %p435_p0 = pneg %p434_p13 }
  0x41   : > { %p440_p4 = pnand %p439_p3, %p435_p0 }
  0x43   : > { %443 = shalt.err (!%p440_p4)
}
  0x44   : > { %s507_s29 = smov 128   ;;  %s508_s16 = smov 8  }
  0x45   : > { %355 = dma.vmem_to_hbm [thread:$0]  (%p570_p9), %s637_s22, 512, %s643_s3, %s216_s9, %s507_s29, %s507_s29, %s508_s16  }
  0x46 PF: > { %s245_s18 = sand.u32 1, %s478_s6   ;;  %p358_p5 = pnand %p318_p12, %p577_p11 }
  0x47   : > { %s246_s27 = scalar_lea.sflag [#allocation4], %s245_s18 }
  0x48   : > { %p359_p6 = pneg %p358_p5 }
  0x4a   : > { %473 = dma.done.wait (%p359_p6), %s246_s27, 512  }
  0x4b   : > { %475 = vsyncadd (%p359_p6), %s246_s27, 4294966784  ;;  %s17_s11 = sadd.s32 1, %s498_s11   ;;  %s699_s6 = smov %s482_s7 }
  0x4c   : > { %p14_p7 = scmp.ge.s32.totalorder %s17_s11, 4   ;;  %s700_s7 = smov %s486_s8 }
  0x4d   : > { %s701_s8 = smov %s575_s20  ;;  %s702_s9 = smov %s494_s10 }
  0x4e   : > { %s703_s10 = smov %s705_s14  ;;  %16 = sbr.rel (!%p14_p7) target bundleno = 6 (0x6), region = 77 }
  0x53   :  { %251 = vsyncpa [#allocation3], 1 }
  0x54   :  { %253 = vsyncpa [#allocation3 + $0x1], 1 }
  0x55   :  { %254 = vsyncpa [#allocation4], 1 }
  0x56   :  { %256 = vsyncpa [#allocation4 + $0x1], 1 }

</bundles_post_ra>
